<compile_context>
chip_gen: v7x
topology: tpu7x:2x2x1
jax: 0.10.0
libtpu: 0.0.40
codegen_flags: <defaults>
</compile_context>

<pallas_src>
import functools

import jax
import jax.numpy as jnp
from jax.experimental import pallas as pl
from jax.experimental.pallas import tpu as pltpu


def _ceil_to(n: int, m: int) -> int:
    return ((n + m - 1) // m) * m


def facemodel_fused_kernel(x_ref, w_ref, b_ref, o_ref):
    """Single-shot path: whole contraction in one grid step.

    x_ref : (Bt_tile, D_pad)  bf16 flattened-image block
    w_ref : (D_pad, E)        bf16 backbone weight (resident across batch tiles)
    b_ref : (1, E)            f32 bias
    o_ref : (Bt_tile, E)      f32 normalized embedding
    """
    emb = jnp.dot(x_ref[...], w_ref[...], preferred_element_type=jnp.float32)
    emb = emb + b_ref[...]
    # logits = emb / sqrt(sum(emb**2, dim=1, keepdim=True) + 1e-5)  -> rsqrt on the EUP
    inv = jax.lax.rsqrt(jnp.sum(emb * emb, axis=1, keepdims=True) + 1e-5)
    o_ref[...] = (emb * inv).astype(o_ref.dtype)


def facemodel_ktiled_kernel(x_ref, w_ref, b_ref, o_ref):
    """K-tiled path: grid = (batch_tiles, k_tiles), reduction axis last.

    o_ref (f32) is resident in VMEM across the K axis and serves as the accumulator.
    """
    k = pl.program_id(1)

    @pl.when(k == 0)
    def _():
        o_ref[...] = jnp.zeros_like(o_ref)

    o_ref[...] += jnp.dot(
        x_ref[...], w_ref[...], preferred_element_type=jnp.float32
    )

    @pl.when(k == pl.num_programs(1) - 1)
    def _():
        emb = o_ref[...] + b_ref[...]
        inv = jax.lax.rsqrt(jnp.sum(emb * emb, axis=1, keepdims=True) + 1e-5)
        o_ref[...] = emb * inv


def _facemodel_forward(x, w, b, *, channel="rgb", iters=1, tk=2048, bt=128,
                       single_shot_weight_bytes=4 << 20):
    """Pallas-backed FaceModel.forward (use_prelogits=False).

    x : (B, C, H, W) float32, NCHW (PyTorch convention)
    w : (D, E) backbone linear weight, D = C*H*W
    b : (E,)   backbone linear bias
    """
    B, C, H, W = x.shape
    D, E = w.shape
    assert D == C * H * W

    # transform_module = identity ('None' transform). Skip concat/mean glue for iters==1.
    # TODO(synk): 'Randomization' transform (iter=10 random resize/pad) has no deterministic
    # Pallas equivalent here; only the default 'None' transform is modeled.
    x_t = x if iters == 1 else jnp.concatenate([x] * iters, axis=0)
    if channel == "bgr":
        x_t = jnp.flip(x_t, axis=1)                     # torch.flip(dims=[1])

    Bt = x_t.shape[0]
    x_flat = x_t.reshape(Bt, D)                         # row-major flatten == torch .view

    # bf16 operand stream (MXU path, half the HBM weight traffic);
    # bias / accumulate / normalize stay in f32 for parity with the reference.
    x_bf = x_flat.astype(jnp.bfloat16)
    w_bf = w.astype(jnp.bfloat16)
    b2 = b.reshape(1, E).astype(jnp.float32)

    # ---- contraction (D) tiling decision ----
    lane = 128
    d_pad128 = _ceil_to(D, lane)
    single_k = (d_pad128 * E * 2) <= single_shot_weight_bytes   # bf16 weight bytes
    tk_eff = d_pad128 if single_k else tk
    d_pad = _ceil_to(D, tk_eff)
    n_k = d_pad // tk_eff
    if d_pad != D:
        x_bf = jnp.pad(x_bf, ((0, 0), (0, d_pad - D)))
        w_bf = jnp.pad(w_bf, ((0, d_pad - D), (0, 0)))

    # ---- batch tiling (parallel grid axis) ----
    if Bt <= bt:
        bt_eff, n_b, bt_pad = Bt, 1, Bt                 # single full-extent block
    else:
        bt_eff = bt
        bt_pad = _ceil_to(Bt, bt)
        n_b = bt_pad // bt
        if bt_pad != Bt:
            x_bf = jnp.pad(x_bf, ((0, bt_pad - Bt), (0, 0)))

    if n_k == 1:
        logits = pl.pallas_call(
            facemodel_fused_kernel,
            out_shape=jax.ShapeDtypeStruct((bt_pad, E), jnp.float32),
            grid_spec=pltpu.PrefetchScalarGridSpec(
                num_scalar_prefetch=0,
                grid=(n_b,),
                in_specs=[
                    pl.BlockSpec((bt_eff, d_pad), lambda i: (i, 0)),   # image block
                    pl.BlockSpec((d_pad, E), lambda i: (0, 0)),        # full weight (resident)
                    pl.BlockSpec((1, E), lambda i: (0, 0)),            # bias
                ],
                out_specs=pl.BlockSpec((bt_eff, E), lambda i: (i, 0)),
            ),
            compiler_params=pltpu.CompilerParams(
                dimension_semantics=("parallel",),
                vmem_limit_bytes=32 * 1024 * 1024,
            ),
        )(x_bf, w_bf, b2)
    else:
        logits = pl.pallas_call(
            facemodel_ktiled_kernel,
            out_shape=jax.ShapeDtypeStruct((bt_pad, E), jnp.float32),
            grid_spec=pltpu.PrefetchScalarGridSpec(
                num_scalar_prefetch=0,
                grid=(n_b, n_k),
                in_specs=[
                    pl.BlockSpec((bt_eff, tk_eff), lambda i, k: (i, k)),
                    pl.BlockSpec((tk_eff, E), lambda i, k: (k, 0)),
                    pl.BlockSpec((1, E), lambda i, k: (0, 0)),
                ],
                out_specs=pl.BlockSpec((bt_eff, E), lambda i, k: (i, 0)),
            ),
            compiler_params=pltpu.CompilerParams(
                dimension_semantics=("parallel", "arbitrary"),
                vmem_limit_bytes=32 * 1024 * 1024,
            ),
        )(x_bf, w_bf, b2)

    logits = logits[:Bt]
    if iters == 1:
        return logits
    # logits.view(iter, B, -1).mean(dim=0)
    return logits.reshape(iters, B, E).mean(axis=0)


# jit the wrapper so the flip / flatten / pad / bf16-cast glue fuses into one XLA program.
facemodel_forward = jax.jit(
    _facemodel_forward,
    static_argnames=("channel", "iters", "tk", "bt", "single_shot_weight_bytes"),
)


def reference_forward(x, w, b, *, channel="rgb", iters=1):
    """Plain-JAX f32 reference mirroring the PyTorch module."""
    B, C, H, W = x.shape
    x_t = jnp.concatenate([x] * iters, axis=0)
    if channel == "bgr":
        x_t = jnp.flip(x_t, axis=1)
    emb = x_t.reshape(iters * B, -1) @ w + b
    logits = emb / jnp.sqrt(jnp.sum(emb**2, axis=1, keepdims=True) + 1e-5)
    return logits.reshape(iters, B, -1).mean(axis=0)


if __name__ == "__main__":
    key = jax.random.PRNGKey(0)

    # ---- Test 1: small shapes (exercises the single-shot fused path) ----
    B, C, H, W = 2, 4, 16, 16          # NCHW input
    E = 128                            # embedding_size (small stand-in for 512)
    D = C * H * W                      # 1024

    k1, k2, k3, key = jax.random.split(key, 4)
    x = jax.random.normal(k1, (B, C, H, W), dtype=jnp.float32)
    w = jax.random.normal(k2, (D, E), dtype=jnp.float32) * 0.02
    b = jax.random.normal(k3, (E,), dtype=jnp.float32) * 0.01

    out = facemodel_forward(x, w, b, channel="rgb", iters=1)
    out = jax.block_until_ready(out)
    ref = reference_forward(x, w, b, channel="rgb", iters=1)
    assert out.shape == (B, E)
    # bf16 operand cast -> moderate tolerance vs. the f32 reference
    assert jnp.allclose(out, ref, atol=2e-2, rtol=2e-2), "mismatch vs reference (fused path)"

    # ---- Test 2: larger D (exercises the K-tiled accumulate-into-output path) ----
    B2, C2, H2, W2 = 4, 3, 64, 64      # D = 12288 -> tk=2048, 6 K steps
    E2 = 256
    D2 = C2 * H2 * W2

    k4, k5, k6, _ = jax.random.split(key, 4)
    x2 = jax.random.normal(k4, (B2, C2, H2, W2), dtype=jnp.float32)
    w2 = jax.random.normal(k5, (D2, E2), dtype=jnp.float32) * 0.01
    b2 = jax.random.normal(k6, (E2,), dtype=jnp.float32) * 0.01

    # force the K-tiled path by capping the single-shot weight budget
    out2 = facemodel_forward(x2, w2, b2, channel="bgr", iters=1,
                             single_shot_weight_bytes=1 << 20)
    out2 = jax.block_until_ready(out2)
    ref2 = reference_forward(x2, w2, b2, channel="bgr", iters=1)
    assert out2.shape == (B2, E2)
    assert jnp.allclose(out2, ref2, atol=2e-2, rtol=2e-2), "mismatch vs reference (tiled path)"

    print("KERNEL_OK")
</pallas_src>

<mosaic_0001>
module attributes {stable_mosaic.version = 11 : i64} {
  func.func @facemodel_fused_kernel(%arg0: i32, %arg1: memref<2x1024xbf16, #tpu.memory_space<vmem>>, %arg2: memref<1024x128xbf16, #tpu.memory_space<vmem>>, %arg3: memref<1x128xf32, #tpu.memory_space<vmem>>, %arg4: memref<2x128xf32, #tpu.memory_space<vmem>>) attributes {dimension_semantics = [#tpu.dimension_semantics<parallel>], iteration_bounds = array<i64: 1>, scalar_prefetch = 0 : i64, scratch_operands = 0 : i64, tpu.core_type = #tpu.core_type<tc>, window_params = [{transform_indices = @transform_0, window_bounds = array<i64: 2, 1024>}, {pipeline_mode = #tpu.pipeline_mode<synchronous>, transform_indices = @transform_1, window_bounds = array<i64: 1024, 128>}, {pipeline_mode = #tpu.pipeline_mode<synchronous>, transform_indices = @transform_2, window_bounds = array<i64: 1, 128>}, {transform_indices = @transform_3, window_bounds = array<i64: 2, 128>}]} {
    %c0 = arith.constant 0 : index
    %c0_0 = arith.constant 0 : index
    %0 = vector.load %arg1[%c0, %c0_0] : memref<2x1024xbf16, #tpu.memory_space<vmem>>, vector<2x1024xbf16>
    %c0_1 = arith.constant 0 : index
    %c0_2 = arith.constant 0 : index
    %1 = vector.load %arg2[%c0_1, %c0_2] : memref<1024x128xbf16, #tpu.memory_space<vmem>>, vector<1024x128xbf16>
    %cst = arith.constant dense<0.000000e+00> : vector<2x128xf32>
    %2 = tpu.matmul %0, %1, %cst {dimension_numbers = #tpu.dot_dimension_numbers<[1], [0], [0], [1], [0, 0, 1, 1], [], []>} : vector<2x1024xbf16>, vector<1024x128xbf16>, vector<2x128xf32> -> vector<2x128xf32>
    %c0_3 = arith.constant 0 : index
    %c0_4 = arith.constant 0 : index
    %3 = vector.load %arg3[%c0_3, %c0_4] : memref<1x128xf32, #tpu.memory_space<vmem>>, vector<1x128xf32>
    %4 = vector.broadcast %3 : vector<1x128xf32> to vector<2x128xf32>
    %5 = arith.addf %2, %4 : vector<2x128xf32>
    %6 = arith.mulf %5, %5 : vector<2x128xf32>
    %cst_5 = arith.constant dense<0.000000e+00> : vector<2xf32>
    %7 = vector.multi_reduction <add>, %6, %cst_5 [1] : vector<2x128xf32> to vector<2xf32>
    %8 = vector.shape_cast %7 : vector<2xf32> to vector<2x1xf32>
    %cst_6 = arith.constant 9.99999974E-6 : f32
    %9 = vector.broadcast %cst_6 : f32 to vector<2x1xf32>
    %10 = arith.addf %8, %9 : vector<2x1xf32>
    %11 = math.rsqrt %10 : vector<2x1xf32>
    %12 = vector.broadcast %11 : vector<2x1xf32> to vector<2x128xf32>
    %13 = arith.mulf %5, %12 : vector<2x128xf32>
    %c0_7 = arith.constant 0 : index
    %c0_8 = arith.constant 0 : index
    %14 = vector.load %arg4[%c0_7, %c0_8] : memref<2x128xf32, #tpu.memory_space<vmem>>, vector<2x128xf32>
    tpu.vector_store %arg4[%c0_7, %c0_8], %13 {strides = array<i32>} : memref<2x128xf32, #tpu.memory_space<vmem>>, vector<2x128xf32>,
    return
  }
  func.func @transform_0(%arg0: i32) -> (i32, i32) {
    %c0_i32 = arith.constant 0 : i32
    %c0_i32_0 = arith.constant 0 : i32
    return %arg0, %c0_i32 : i32, i32
  }
  func.func @transform_1(%arg0: i32) -> (i32, i32) {
    %c0_i32 = arith.constant 0 : i32
    %c0_i32_0 = arith.constant 0 : i32
    %c0_i32_1 = arith.constant 0 : i32
    return %c0_i32, %c0_i32_0 : i32, i32
  }
  func.func @transform_2(%arg0: i32) -> (i32, i32) {
    %c0_i32 = arith.constant 0 : i32
    %c0_i32_0 = arith.constant 0 : i32
    %c0_i32_1 = arith.constant 0 : i32
    return %c0_i32, %c0_i32_0 : i32, i32
  }
  func.func @transform_3(%arg0: i32) -> (i32, i32) {
    %c0_i32 = arith.constant 0 : i32
    %c0_i32_0 = arith.constant 0 : i32
    return %arg0, %c0_i32 : i32, i32
  }
}

</mosaic_0001>

<bundles_post_ra>
// kernel: _facemodel_forward.1
= control target key start
LH: loop header
LB: loop body
LE: loop exit
PB: predicated region body
PF: predicated region fallthrough
CT: control target
= control target key end

     0   :  { %v157_v28 = vlaneseq  ;;  %v1023_v36 = vmov 1966171168   ;;  %s1268_s0 = inlined_call_operand.vmem [shape: bf16[2,1024], index: 0, kind: input, shape index: {}]   ;;  %s1269_s1 = inlined_call_operand.vmem [shape: bf16[1024,128], index: 1, kind: input, shape index: {}]   ;;  %s1270_s2 = inlined_call_operand.vmem [shape: f32[1,128], index: 2, kind: input, shape index: {}]   ;;  %s1271_s3 = inlined_call_operand.hbm [shape: f32[2,128], index: 3, kind: output, shape index: {}]  }
   0x1   :  { %v932_v0 = vld [vmem:[%s1269_s1 + $0x40] sm:$0xff]   ;;  %v936_v4 = vld [vmem:[%s1269_s1 + $0x48] sm:$0xff]   ;;  %v940_v8 = vld [vmem:[%s1269_s1 + $0x50] sm:$0xff]   ;;  %v155_v37 = vunpack.c.l.s4 %v1023_v36 }
   0x2   :  { %v933_v1 = vld [vmem:[%s1269_s1 + $0xc0] sm:$0xff]   ;;  %842 = vmatprep.subr.bf16.mxu0 %v932_v0  ;;  %v937_v5 = vld [vmem:[%s1269_s1 + $0xc8] sm:$0xff]   ;;  %v941_v9 = vld [vmem:[%s1269_s1 + $0xd0] sm:$0xff]   ;;  %v158_v33 = vshrl.u32 %v157_v28, 7 }
   0x3   :  { %v934_v2 = vld [vmem:[%s1269_s1] sm:$0xff]   ;;  %864 = vmatprep.subr.bf16.mxu1 %v933_v1  ;;  %v938_v6 = vld [vmem:[%s1269_s1 + $0x8] sm:$0xff]   ;;  %v942_v10 = vld [vmem:[%s1269_s1 + $0x10] sm:$0xff]   ;;  %v156_v40 = vunpack.c.0.s8 %v155_v37 }
   0x4   :  { %v935_v3 = vld [vmem:[%s1269_s1 + $0x80] sm:$0xff]   ;;  %843 = vmatpush3.bf16.msra.mxu0 %v934_v2  ;;  %v939_v7 = vld [vmem:[%s1269_s1 + $0x88] sm:$0xff]   ;;  %v943_v11 = vld [vmem:[%s1269_s1 + $0x90] sm:$0xff]  }
   0x5   :  { %865 = vmatpush3.bf16.msra.mxu1 %v935_v3  ;;  %844 = vmatprep.subr.bf16.mxu0 %v936_v4  ;;  %v944_v12 = vld [vmem:[%s1269_s1 + $0x58] sm:$0xff]   ;;  %v948_v16 = vld [vmem:[%s1269_s1 + $0x60] sm:$0xff]   ;;  %v952_v20 = vld [vmem:[%s1269_s1 + $0x68] sm:$0xff]   ;;  %v1150_v41 = vsub.s32 %v156_v40, %v158_v33 }
   0x6   :  { %866 = vmatprep.subr.bf16.mxu1 %v937_v5  ;;  %v945_v13 = vld [vmem:[%s1269_s1 + $0xd8] sm:$0xff]   ;;  %v949_v17 = vld [vmem:[%s1269_s1 + $0xe0] sm:$0xff]   ;;  %v953_v21 = vld [vmem:[%s1269_s1 + $0xe8] sm:$0xff]  }
   0x7   :  { %v946_v14 = vld [vmem:[%s1269_s1 + $0x18] sm:$0xff]   ;;  %v950_v18 = vld [vmem:[%s1269_s1 + $0x20] sm:$0xff]   ;;  %v954_v22 = vld [vmem:[%s1269_s1 + $0x28] sm:$0xff]  }
   0x8   :  { %845 = vmatpush3.bf16.msra.mxu0 %v938_v6  ;;  %v947_v15 = vld [vmem:[%s1269_s1 + $0x98] sm:$0xff]   ;;  %v951_v19 = vld [vmem:[%s1269_s1 + $0xa0] sm:$0xff]   ;;  %v955_v23 = vld [vmem:[%s1269_s1 + $0xa8] sm:$0xff]  }
   0x9   :  { %867 = vmatpush3.bf16.msra.mxu1 %v939_v7  ;;  %846 = vmatprep.subr.bf16.mxu0 %v940_v8  ;;  %v956_v24 = vld [vmem:[%s1269_s1 + $0x70] sm:$0xff]   ;;  %v960_v29 = vld [vmem:[%s1269_s1 + $0x78] sm:$0xff]   ;;  %v16_v34 = vld [vmem:[%s1268_s0] sm:$0xff] }
   0xa   :  { %868 = vmatprep.subr.bf16.mxu1 %v941_v9  ;;  %v957_v25 = vld [vmem:[%s1269_s1 + $0xf0] sm:$0xff]   ;;  %v961_v30 = vld [vmem:[%s1269_s1 + $0xf8] sm:$0xff]   ;;  %v965_v35 = vld [vmem:[%s1269_s1 + $0x140] sm:$0xff]   ;;  %v153_v39 = vcombine.high %v16_v34, %v16_v34  ;;  %v160_v42 = vrot.slane %v16_v34, %v1150_v41 }
   0xb   :  { %v958_v26 = vld [vmem:[%s1269_s1 + $0x30] sm:$0xff]   ;;  %v962_v31 = vld [vmem:[%s1269_s1 + $0x38] sm:$0xff]   ;;  %v966_v38 = vld [vmem:[%s1269_s1 + $0x1c0] sm:$0xff]  }
   0xc   :  { %847 = vmatpush3.bf16.msra.mxu0 %v942_v10  ;;  %v959_v27 = vld [vmem:[%s1269_s1 + $0xb0] sm:$0xff]   ;;  %v963_v32 = vld [vmem:[%s1269_s1 + $0xb8] sm:$0xff]   ;;  %v1154_v43 = vrot.slane %v153_v39, %v1150_v41  ;;  %v168_v44 = vcombine.high %v160_v42, %v160_v42  ;;  %v176_v45 = vrot.slane %v160_v42, %v1150_v41  ;;  %v967_v48 = vld [vmem:[%s1269_s1 + $0x100] sm:$0xff]  }
   0xd   :  { %869 = vmatpush3.bf16.msra.mxu1 %v943_v11  ;;  %848 = vmatprep.subr.bf16.mxu0 %v944_v12  ;;  %v969_v51 = vld [vmem:[%s1269_s1 + $0x148] sm:$0xff]   ;;  %v968_v53 = vld [vmem:[%s1269_s1 + $0x180] sm:$0xff]   ;;  %v973_v57 = vld [vmem:[%s1269_s1 + $0x150] sm:$0xff]  }
   0xe   :  { %870 = vmatprep.subr.bf16.mxu1 %v945_v13  ;;  %v169_v46 = vcombine.high %v1154_v43, %v1154_v43  ;;  %v190_v47 = vrot.slane %v168_v44, %v1150_v41  ;;  %v198_v50 = vcombine.high %v176_v45, %v176_v45  ;;  %v970_v54 = vld [vmem:[%s1269_s1 + $0x1c8] sm:$0xff]   ;;  %v974_v59 = vld [vmem:[%s1269_s1 + $0x1d0] sm:$0xff]   ;;  %v977_v61 = vld [vmem:[%s1269_s1 + $0x158] sm:$0xff]  }
   0xf   :  { %v971_v56 = vld [vmem:[%s1269_s1 + $0x108] sm:$0xff]   ;;  %v975_v60 = vld [vmem:[%s1269_s1 + $0x110] sm:$0xff]   ;;  %v978_v63 = vld [vmem:[%s1269_s1 + $0x1d8] sm:$0xff]  }
  0x10   :  { %849 = vmatpush3.bf16.msra.mxu0 %v946_v14  ;;  %v197_v49 = vrot.slane %v169_v46, %v1150_v41  ;;  %626 = vmatprep.mubr.bf16.mxu0 %v190_v47  ;;  %v200_v52 = vcombine.high %v190_v47, %v190_v47  ;;  %v972_v58 = vld [vmem:[%s1269_s1 + $0x188] sm:$0xff]   ;;  %v976_v62 = vld [vmem:[%s1269_s1 + $0x190] sm:$0xff]   ;;  %v979_v0 = vld [vmem:[%s1269_s1 + $0x118] sm:$0xff]  }
  0x11   :  { %871 = vmatpush3.bf16.msra.mxu1 %v947_v15  ;;  %850 = vmatprep.subr.bf16.mxu0 %v948_v16  ;;  %v981_v1 = vld [vmem:[%s1269_s1 + $0x160] sm:$0xff]   ;;  %v980_v2 = vld [vmem:[%s1269_s1 + $0x198] sm:$0xff]   ;;  %v985_v5 = vld [vmem:[%s1269_s1 + $0x168] sm:$0xff]  }
  0x12   :  { %872 = vmatprep.subr.bf16.mxu1 %v949_v17  ;;  %v201_v55 = vcombine.high %v197_v49, %v197_v49  ;;  %666 = vmatprep.mubr.bf16.mxu1 %v200_v52  ;;  %v982_v3 = vld [vmem:[%s1269_s1 + $0x1e0] sm:$0xff]   ;;  %v986_v7 = vld [vmem:[%s1269_s1 + $0x1e8] sm:$0xff]   ;;  %v989_v9 = vld [vmem:[%s1269_s1 + $0x170] sm:$0xff]  }
  0x13   :  { %v983_v4 = vld [vmem:[%s1269_s1 + $0x120] sm:$0xff]   ;;  %v987_v8 = vld [vmem:[%s1269_s1 + $0x128] sm:$0xff]  }
  0x14   :  { %851 = vmatpush3.bf16.msra.mxu0 %v950_v18  ;;  %v984_v6 = vld [vmem:[%s1269_s1 + $0x1a0] sm:$0xff]  }
  0x15   :  { %873 = vmatpush3.bf16.msra.mxu1 %v951_v19  ;;  %852 = vmatprep.subr.bf16.mxu0 %v952_v20 }
  0x16   :  { %874 = vmatprep.subr.bf16.mxu1 %v953_v21 }
  0x18   :  { %853 = vmatpush3.bf16.msra.mxu0 %v954_v22 }
  0x19   :  { %875 = vmatpush3.bf16.msra.mxu1 %v955_v23  ;;  %854 = vmatprep.subr.bf16.mxu0 %v956_v24 }
  0x1a   :  { %876 = vmatprep.subr.bf16.mxu1 %v957_v25 }
  0x1c   :  { %855 = vmatpush3.bf16.msra.mxu0 %v958_v26 }
  0x1d   :  { %877 = vmatpush3.bf16.msra.mxu1 %v959_v27  ;;  %856 = vmatprep.subr.bf16.mxu0 %v960_v29 }
  0x1e   :  { %878 = vmatprep.subr.bf16.mxu1 %v961_v30 }
  0x20   :  { %857 = vmatpush3.bf16.msra.mxu0 %v962_v31 }
  0x21   :  { %879 = vmatpush3.bf16.msra.mxu1 %v963_v32  ;;  %886 = vmatprep.subr.bf16.mxu0 %v965_v35 }
  0x22   :  { %908 = vmatprep.subr.bf16.mxu1 %v966_v38 }
  0x23   :  { %627 = vmatmul.mubr.bf16.vlgmr.msra.gmra.mrb[0].mxu0 %v176_v45 }
  0x24   :  { %887 = vmatpush3.bf16.msra.mxu0 %v967_v48  ;;  %667 = vmatmul.mubr.bf16.vlgmr.msra.gmra.mrb[0].mxu1 %v198_v50 }
  0x25   :  { %888 = vmatprep.subr.bf16.mxu0 %v969_v51  ;;  %909 = vmatpush3.bf16.msra.mxu1 %v968_v53 }
  0x26   :  { %706 = vmatprep.mubr.bf16.mxu0 %v197_v49  ;;  %910 = vmatprep.subr.bf16.mxu1 %v970_v54 }
  0x27   :  { %746 = vmatprep.mubr.bf16.mxu1 %v201_v55 }
  0x28   :  { %889 = vmatpush3.bf16.msra.mxu0 %v971_v56 }
  0x29   :  { %890 = vmatprep.subr.bf16.mxu0 %v973_v57  ;;  %911 = vmatpush3.bf16.msra.mxu1 %v972_v58 }
  0x2a   :  { %912 = vmatprep.subr.bf16.mxu1 %v974_v59 }
  0x2c   :  { %891 = vmatpush3.bf16.msra.mxu0 %v975_v60 }
  0x2d   :  { %892 = vmatprep.subr.bf16.mxu0 %v977_v61  ;;  %913 = vmatpush3.bf16.msra.mxu1 %v976_v62 }
  0x2e   :  { %914 = vmatprep.subr.bf16.mxu1 %v978_v63 }
  0x30   :  { %893 = vmatpush3.bf16.msra.mxu0 %v979_v0 }
  0x31   :  { %894 = vmatprep.subr.bf16.mxu0 %v981_v1  ;;  %915 = vmatpush3.bf16.msra.mxu1 %v980_v2 }
  0x32   :  { %916 = vmatprep.subr.bf16.mxu1 %v982_v3 }
  0x34   :  { %895 = vmatpush3.bf16.msra.mxu0 %v983_v4 }
  0x35   :  { %896 = vmatprep.subr.bf16.mxu0 %v985_v5 }
  0x36   :  { %8 = vsyncpa [#allocation3], 0  ;;  %917 = vmatpush3.bf16.msra.mxu1 %v984_v6  ;;  %v988_v10 = vld [vmem:[%s1269_s1 + $0x1a8] sm:$0xff]   ;;  %v990_v11 = vld [vmem:[%s1269_s1 + $0x1f0] sm:$0xff]   ;;  %v183_v17 = vrot.slane %v1154_v43, %v1150_v41  ;;  %vm755_vm0 = vcmask 1041408  }
  0x37   :  { %918 = vmatprep.subr.bf16.mxu1 %v986_v7  ;;  %v991_v12 = vld [vmem:[%s1269_s1 + $0x130] sm:$0xff]   ;;  %v993_v13 = vld [vmem:[%s1269_s1 + $0x178] sm:$0xff]   ;;  %v777_v21 = vld [vmem:[%s1270_s2] ss:$0 sm:$0xff] }
  0x38   :  { %897 = vmatpush3.bf16.msra.mxu0 %v987_v8  ;;  %v992_v14 = vld [vmem:[%s1269_s1 + $0x1b0] sm:$0xff]   ;;  %v994_v15 = vld [vmem:[%s1269_s1 + $0x1f8] sm:$0xff]   ;;  %v199_v19 = vcombine.high %v183_v17, %v183_v17 }
  0x39   :  { %898 = vmatprep.subr.bf16.mxu0 %v989_v9  ;;  %v995_v16 = vld [vmem:[%s1269_s1 + $0x138] sm:$0xff]  }
  0x3a   :  { %919 = vmatpush3.bf16.msra.mxu1 %v988_v10  ;;  %v996_v18 = vld [vmem:[%s1269_s1 + $0x1b8] sm:$0xff]   ;;  %s1024_s1 = smov [#allocation2]  }
  0x3b   :  { %920 = vmatprep.subr.bf16.mxu1 %v990_v11  ;;  %s769_s2 = sshll.u32 %s1024_s1, 4  ;;  %s770_s2 = int_to_ptr.vmem [resolvable:$true] %s769_s2 }
  0x3c   :  { %899 = vmatpush3.bf16.msra.mxu0 %v991_v12  ;;  %s999_s6 = scalar_lea.vmem %s770_s2, 32  ;;  %p1004_p1 = scmp.lt.s32.totalorder %s770_s2, %s770_s2 }
  0x3d   :  { %900 = vmatprep.subr.bf16.mxu0 %v993_v13  ;;  %p1000_p0 = scmp.ne.s32.totalorder %s770_s2, %s999_s6  ;;  %p1005_p2 = scmp.lt.s32.totalorder %s999_s6, %s999_s6 }
  0x3e   :  { %921 = vmatpush3.bf16.msra.mxu1 %v992_v14 }
  0x3f   :  { %922 = vmatprep.subr.bf16.mxu1 %v994_v15  ;;  %p1006_p3 = por %p1005_p2, %p1004_p1 }
  0x40   :  { %901 = vmatpush3.bf16.msra.mxu0 %v995_v16 }
  0x41   :  { %p1007_p4 = pnand %p1006_p3, %p1000_p0 }
  0x42   :  { %923 = vmatpush3.bf16.msra.mxu1 %v996_v18 }
  0x43   :  { %707 = vmatmul.mubr.bf16.vlgmr.msra.gmra.mrb[4].mxu0 %v183_v17 }
  0x45   :  { %747 = vmatmul.mubr.bf16.vlgmr.msra.gmra.mrb[4].mxu1 %v199_v19 }
  0xf6   :  { %v858_v20 = vpop.f32.mrb[0].mxu0 }
  0xf7   :  { %v859_v22 = vpop.f32.mrb[1].mxu0  ;;  %v880_v23 = vpop.f32.mrb[0].mxu1 }
  0xf8   :  { %v860_v24 = vadd.f32 %v859_v22, %v858_v20  ;;  %v861_v25 = vpop.f32.mrb[2].mxu0  ;;  %v881_v26 = vpop.f32.mrb[1].mxu1 }
  0xf9   :  { %v862_v27 = vpop.f32.mrb[3].mxu0  ;;  %v882_v29 = vadd.f32 %v881_v26, %v880_v23  ;;  %v883_v30 = vpop.f32.mrb[2].mxu1 }
  0xfa   :  { %v629_v28 = vadd.f32 %v860_v24, %v777_v21  ;;  %v884_v31 = vpop.f32.mrb[3].mxu1 }
  0xfc   :  { %v669_v32 = vadd.f32 %v882_v29, %v629_v28 }
 0x116   :  { %v902_v33 = vpop.f32.mrb[4].mxu0 }
 0x117   :  { %v903_v34 = vpop.f32.mrb[5].mxu0 }
 0x118   :  { %v924_v35 = vpop.f32.mrb[4].mxu1  ;;  %v904_v36 = vadd.f32 %v903_v34, %v902_v33  ;;  %v905_v37 = vpop.f32.mrb[6].mxu0 }
 0x119   :  { %v925_v38 = vpop.f32.mrb[5].mxu1  ;;  %v906_v39 = vpop.f32.mrb[7].mxu0 }
 0x11a   :  { %v709_v40 = vadd.f32 %v904_v36, %v669_v32  ;;  %v926_v41 = vadd.f32 %v925_v38, %v924_v35  ;;  %v927_v42 = vpop.f32.mrb[6].mxu1 }
 0x11b   :  { %v928_v43 = vpop.f32.mrb[7].mxu1 }
 0x11c   :  { %v749_v44 = vadd.f32 %v926_v41, %v709_v40 }
 0x11e   :  { %v754_v45 = vmul.f32 %v749_v44, %v749_v44 }
 0x120   :  { %v756_v46 = vsel %vm755_vm0, %v754_v45, 0.0 }
 0x121   :  { %757 = vadd.xlane.f32.xlu0 %v756_v46 }
 0x1ae   :  { %v758_v47 = vpop.xlane.xlu0 %757 }
 0x1af   :  { %v759_v48 = vadd.f32 1e-05, %v758_v47 }
 0x1b1   :  { %997 = vrsqrt.f32 %v759_v48 }
 0x1bb   :  { %v998_v49 = vpop.eup %997 }
 0x1bc   :  { %v761_v50 = vmul.f32 %v998_v49, %v749_v44 }
 0x1be   :  { %762 = vst [vmem:[#allocation2] sm:$0x3] %v761_v50 }
 0x1bf   :  { %1010 = shalt.err (!%p1007_p4)
}
 0x1c0   :  { %s1011_s9 = scalar_lea.hbm %s1271_s3, 32 }
 0x1c1   :  { %p1012_p5 = scmp.ne.s32.totalorder %s1271_s3, %s1011_s9  ;;  %p1015_p6 = scmp.lt.u32.totalorder %s1011_s9, %s1271_s3 }
 0x1c3   :  { %p1017_p7 = pnand %p1015_p6, %p1012_p5 }
 0x1c5   :  { %1020 = shalt.err (!%p1017_p7)
}
 0x1c6   :  { %772 = dma.vmem_to_hbm [thread:$0]  %s770_s2, 32, %s1271_s3, [#allocation3]  }
 0x1c7   :  { %1021 = dma.done.wait [#allocation3], 32  }
 0x1c8   :  { %1022 = vsyncadd [#allocation3], 4294967264 }
 0x1c9   :  { %776 = vsyncpa [#allocation3], 1 }

</bundles_post_ra>
